<compile_context>
chip_gen: v6e
topology: v6e:2x2x1
jax: 0.10.0
libtpu: 0.0.40
codegen_flags: <defaults>
</compile_context>

<pallas_src>
import jax
import jax.numpy as jnp
from jax.experimental import pallas as pl
from jax.experimental.pallas import tpu as pltpu


def _fusion_kernel(x_ref, w1_ref, b1_ref, w2_ref, b2_ref, o_ref):
    # x_ref:  (bn, C_in, t_hw)   bn batch slices, spatial positions on lanes (lane-dense)
    # w1_ref: (C_mid, C_in), b1_ref: (C_mid, 128)   (BN1 folded in; bias lane-dense)
    # w2_ref: (C_out, C_mid), b2_ref: (C_out, 128)  (BN2 folded in; bias lane-dense)
    # o_ref:  (bn, C_out, t_hw)
    w1 = w1_ref[...]
    w2 = w2_ref[...]
    b1 = b1_ref[...][:, :1]   # full-width unmasked load, keep one column for broadcast
    b2 = b2_ref[...][:, :1]
    bn = x_ref.shape[0]
    for i in range(bn):       # static unroll over batch slices in the block
        x = x_ref[i].astype(jnp.float32)                                  # (C_in, t_hw)
        h = jnp.dot(w1, x, preferred_element_type=jnp.float32) + b1
        h = jnp.maximum(h, 0.0)
        y = jnp.dot(w2, h, preferred_element_type=jnp.float32) + b2
        y = jnp.maximum(y, 0.0)
        o_ref[i] = y.astype(o_ref.dtype)


def _choose_tiling(N, HW, *, target_lanes=32768, max_lanes=65536, max_batch_block=16):
    """Pick (bn, t_hw): batch-block size and spatial tile.

    Memory-bound kernel: each grid step should move >= ~target_lanes spatial positions
    (~1.5-3 MB of f32 activations) so DMA time dominates the ~0.35 us per-step overhead,
    while double-buffered blocks (~192 B/lane with padding) stay well under scoped VMEM
    (<= ~12.6 MiB at max_lanes).  Prefer full-HW slabs (one contiguous DMA per batch
    slice); fold batch elements when HW alone is too small.
    """
    if HW <= max_lanes:
        t_hw = HW  # full spatial extent: contiguous slab, legal even if not 128-aligned
        bn = min(N, max_batch_block, max(1, max_lanes // HW), pl.cdiv(target_lanes, HW))
        bn = max(bn, 1)
    else:
        bn = 1
        # Largest multiple-of-128 divisor of HW in [target_lanes, max_lanes] -> every
        # store is a full unmasked vst; otherwise a max_lanes tile with a masked tail.
        best = 0
        t = (target_lanes // 128) * 128
        while t <= max_lanes:
            if HW % t == 0:
                best = t
            t += 128
        t_hw = best if best else max_lanes
    return bn, t_hw


def temporal_fusion_pallas(x_nchw, w1, b1, w2, b2, *, target_lanes=32768, max_lanes=65536):
    """x_nchw: [N, C_in, H, W]; w1: [C_mid, C_in]; b1: [C_mid]; w2: [C_out, C_mid]; b2: [C_out]."""
    N, C_in, H, W = x_nchw.shape
    C_mid = w1.shape[0]
    C_out = w2.shape[0]
    HW = H * W

    x3 = x_nchw.reshape(N, C_in, HW)  # free view, no data movement

    bn, t_hw = _choose_tiling(N, HW, target_lanes=target_lanes, max_lanes=max_lanes)
    grid = (pl.cdiv(N, bn), pl.cdiv(HW, t_hw))

    # Lane-dense resident biases: (C, 128) avoids masked 1-lane-wide VMEM blocks.
    b1_t = jnp.broadcast_to(b1.reshape(C_mid, 1).astype(jnp.float32), (C_mid, 128))
    b2_t = jnp.broadcast_to(b2.reshape(C_out, 1).astype(jnp.float32), (C_out, 128))

    itemsize = jnp.dtype(x_nchw.dtype).itemsize
    cost = pl.CostEstimate(
        flops=2 * N * HW * (C_mid * C_in + C_out * C_mid),
        transcendentals=0,
        bytes_accessed=N * HW * (C_in + C_out) * itemsize
        + (w1.size + w2.size) * 4 + (b1_t.size + b2_t.size) * 4,
    )

    out3 = pl.pallas_call(
        _fusion_kernel,
        out_shape=jax.ShapeDtypeStruct((N, C_out, HW), x_nchw.dtype),
        grid_spec=pltpu.PrefetchScalarGridSpec(
            num_scalar_prefetch=0,
            grid=grid,
            in_specs=[
                # Activations: bn batch slices x one full/large spatial tile per step.
                pl.BlockSpec((bn, C_in, t_hw), lambda nb, sb: (nb, 0, sb)),
                # Tiny weights / biases: constant index_map -> resident across steps.
                pl.BlockSpec((C_mid, C_in), lambda nb, sb: (0, 0)),
                pl.BlockSpec((C_mid, 128), lambda nb, sb: (0, 0)),
                pl.BlockSpec((C_out, C_mid), lambda nb, sb: (0, 0)),
                pl.BlockSpec((C_out, 128), lambda nb, sb: (0, 0)),
            ],
            out_specs=pl.BlockSpec((bn, C_out, t_hw), lambda nb, sb: (nb, 0, sb)),
        ),
        compiler_params=pltpu.CompilerParams(
            dimension_semantics=("parallel", "parallel"),
            vmem_limit_bytes=32 * 1024 * 1024,
        ),
        cost_estimate=cost,
    )(x3, w1, b1_t, w2, b2_t)

    return out3.reshape(N, C_out, H, W)


def fold_bn(conv_w, conv_b, gamma, beta, running_mean, running_var, eps=1e-5):
    """Fold eval-mode BatchNorm into the preceding 1x1 conv.

    conv_w: [C_out, C_in] (1x1 kernel squeezed), conv_b: [C_out].
    Returns (W, b) with y = W @ x + b[:, None] for x: [C_in, S].
    """
    scale = gamma / jnp.sqrt(running_var + eps)            # [C_out]
    w = conv_w * scale[:, None]                            # [C_out, C_in]
    b = (conv_b - running_mean) * scale + beta             # [C_out]
    return w.astype(jnp.float32), b.astype(jnp.float32)


def reference_forward_folded(x_nchw, w1, b1, w2, b2):
    N, C, H, W = x_nchw.shape
    x = x_nchw.reshape(N, C, H * W)
    h = jnp.maximum(jnp.einsum('oc,ncs->nos', w1, x) + b1[None, :, None], 0.0)
    y = jnp.maximum(jnp.einsum('oc,ncs->nos', w2, h) + b2[None, :, None], 0.0)
    return y.reshape(N, -1, H, W)


def reference_forward_unfolded(x_nchw, c1w, c1b, g1, be1, m1, v1,
                               c2w, c2b, g2, be2, m2, v2, eps=1e-5):
    """Conv -> eval-mode BN -> ReLU -> Conv -> eval-mode BN -> ReLU, un-folded."""
    N, C, H, W = x_nchw.shape
    xs = x_nchw.reshape(N, C, H * W)

    def bn(t, g, be, m, v):
        return (t - m[None, :, None]) / jnp.sqrt(v[None, :, None] + eps) \
            * g[None, :, None] + be[None, :, None]

    h = jnp.einsum('oc,ncs->nos', c1w, xs) + c1b[None, :, None]
    h = jnp.maximum(bn(h, g1, be1, m1, v1), 0.0)
    y = jnp.einsum('oc,ncs->nos', c2w, h) + c2b[None, :, None]
    y = jnp.maximum(bn(y, g2, be2, m2, v2), 0.0)
    return y.reshape(N, -1, H, W)


if __name__ == "__main__":
    # Module hyper-parameters (defaults from __init__)
    input_channels = 9
    mid_channels = input_channels // 2   # 4
    reduced_channels = 3

    # Small deterministic example input: batch=2, C=9, H=W=16
    key = jax.random.PRNGKey(0)
    (k_x, k_w1, k_b1, k_w2, k_b2, k_g1, k_be1, k_g2, k_be2,
     k_m1, k_v1, k_m2, k_v2) = jax.random.split(key, 13)
    x = jax.random.normal(k_x, (2, input_channels, 16, 16), dtype=jnp.float32)

    # Deterministic synthetic parameters (no checkpoint load).
    conv1_w = 0.1 * jax.random.normal(k_w1, (mid_channels, input_channels), jnp.float32)
    conv1_b = 0.1 * jax.random.normal(k_b1, (mid_channels,), jnp.float32)
    conv2_w = 0.1 * jax.random.normal(k_w2, (reduced_channels, mid_channels), jnp.float32)
    conv2_b = 0.1 * jax.random.normal(k_b2, (reduced_channels,), jnp.float32)

    # BatchNorm (eval-mode) parameters & running stats.
    bn1_gamma = 1.0 + 0.05 * jax.random.normal(k_g1, (mid_channels,), jnp.float32)
    bn1_beta = 0.05 * jax.random.normal(k_be1, (mid_channels,), jnp.float32)
    bn1_mean = 0.05 * jax.random.normal(k_m1, (mid_channels,), jnp.float32)
    bn1_var = 1.0 + 0.05 * jnp.abs(jax.random.normal(k_v1, (mid_channels,), jnp.float32))
    bn2_gamma = 1.0 + 0.05 * jax.random.normal(k_g2, (reduced_channels,), jnp.float32)
    bn2_beta = 0.05 * jax.random.normal(k_be2, (reduced_channels,), jnp.float32)
    bn2_mean = 0.05 * jax.random.normal(k_m2, (reduced_channels,), jnp.float32)
    bn2_var = 1.0 + 0.05 * jnp.abs(jax.random.normal(k_v2, (reduced_channels,), jnp.float32))

    # TODO(synk): BN is folded in eval mode (running stats); training-mode batch-stat BN
    # would need a separate reduction pass and is not implemented here.
    w1, b1 = fold_bn(conv1_w, conv1_b, bn1_gamma, bn1_beta, bn1_mean, bn1_var)
    w2, b2 = fold_bn(conv2_w, conv2_b, bn2_gamma, bn2_beta, bn2_mean, bn2_var)

    out = temporal_fusion_pallas(x, w1, b1, w2, b2)
    out = jax.block_until_ready(out)

    ref_folded = reference_forward_folded(x, w1, b1, w2, b2)
    ref_unfolded = reference_forward_unfolded(
        x, conv1_w, conv1_b, bn1_gamma, bn1_beta, bn1_mean, bn1_var,
        conv2_w, conv2_b, bn2_gamma, bn2_beta, bn2_mean, bn2_var)

    assert out.shape == (2, reduced_channels, 16, 16)
    assert jnp.allclose(out, ref_folded, atol=1e-5, rtol=1e-5)
    assert jnp.allclose(out, ref_unfolded, atol=1e-4, rtol=1e-4)

    print("KERNEL_OK")
</pallas_src>

<mosaic_0001>
module attributes {stable_mosaic.version = 11 : i64} {
  func.func @_fusion_kernel(%arg0: i32, %arg1: i32, %arg2: memref<2x9x256xf32, #tpu.memory_space<vmem>>, %arg3: memref<4x9xf32, #tpu.memory_space<vmem>>, %arg4: memref<4x128xf32, #tpu.memory_space<vmem>>, %arg5: memref<3x4xf32, #tpu.memory_space<vmem>>, %arg6: memref<3x128xf32, #tpu.memory_space<vmem>>, %arg7: memref<2x3x256xf32, #tpu.memory_space<vmem>>) attributes {dimension_semantics = [#tpu.dimension_semantics<parallel>, #tpu.dimension_semantics<parallel>], iteration_bounds = array<i64: 1, 1>, scalar_prefetch = 0 : i64, scratch_operands = 0 : i64, tpu.core_type = #tpu.core_type<tc>, window_params = [{transform_indices = @transform_0, window_bounds = array<i64: 2, 9, 256>}, {pipeline_mode = #tpu.pipeline_mode<synchronous>, transform_indices = @transform_1, window_bounds = array<i64: 4, 9>}, {pipeline_mode = #tpu.pipeline_mode<synchronous>, transform_indices = @transform_2, window_bounds = array<i64: 4, 128>}, {pipeline_mode = #tpu.pipeline_mode<synchronous>, transform_indices = @transform_3, window_bounds = array<i64: 3, 4>}, {pipeline_mode = #tpu.pipeline_mode<synchronous>, transform_indices = @transform_4, window_bounds = array<i64: 3, 128>}, {transform_indices = @transform_5, window_bounds = array<i64: 2, 3, 256>}]} {
    %c0 = arith.constant 0 : index
    %c0_0 = arith.constant 0 : index
    %0 = vector.load %arg3[%c0, %c0_0] : memref<4x9xf32, #tpu.memory_space<vmem>>, vector<4x9xf32>
    %c0_1 = arith.constant 0 : index
    %c0_2 = arith.constant 0 : index
    %1 = vector.load %arg5[%c0_1, %c0_2] : memref<3x4xf32, #tpu.memory_space<vmem>>, vector<3x4xf32>
    %c0_3 = arith.constant 0 : index
    %c0_4 = arith.constant 0 : index
    %2 = vector.load %arg4[%c0_3, %c0_4] : memref<4x128xf32, #tpu.memory_space<vmem>>, vector<4x128xf32>
    %3 = vector.extract_strided_slice %2 {offsets = [0, 0], sizes = [4, 1], strides = [1, 1]} : vector<4x128xf32> to vector<4x1xf32>
    %c0_5 = arith.constant 0 : index
    %c0_6 = arith.constant 0 : index
    %4 = vector.load %arg6[%c0_5, %c0_6] : memref<3x128xf32, #tpu.memory_space<vmem>>, vector<3x128xf32>
    %5 = vector.extract_strided_slice %4 {offsets = [0, 0], sizes = [3, 1], strides = [1, 1]} : vector<3x128xf32> to vector<3x1xf32>
    %c0_7 = arith.constant 0 : index
    %c0_8 = arith.constant 0 : index
    %c0_9 = arith.constant 0 : index
    %6 = vector.load %arg2[%c0_7, %c0_8, %c0_9] : memref<2x9x256xf32, #tpu.memory_space<vmem>>, vector<1x9x256xf32>
    %7 = vector.shape_cast %6 : vector<1x9x256xf32> to vector<9x256xf32>
    %cst = arith.constant dense<0.000000e+00> : vector<4x256xf32>
    %8 = tpu.matmul %0, %7, %cst {dimension_numbers = #tpu.dot_dimension_numbers<[1], [0], [0], [1], [0, 0, 1, 1], [], []>} : vector<4x9xf32>, vector<9x256xf32>, vector<4x256xf32> -> vector<4x256xf32>
    %9 = vector.broadcast %3 : vector<4x1xf32> to vector<4x256xf32>
    %10 = arith.addf %8, %9 : vector<4x256xf32>
    %cst_10 = arith.constant 0.000000e+00 : f32
    %11 = vector.broadcast %cst_10 : f32 to vector<4x256xf32>
    %12 = arith.maximumf %10, %11 : vector<4x256xf32>
    %cst_11 = arith.constant dense<0.000000e+00> : vector<3x256xf32>
    %13 = tpu.matmul %1, %12, %cst_11 {dimension_numbers = #tpu.dot_dimension_numbers<[1], [0], [0], [1], [0, 0, 1, 1], [], []>} : vector<3x4xf32>, vector<4x256xf32>, vector<3x256xf32> -> vector<3x256xf32>
    %14 = vector.broadcast %5 : vector<3x1xf32> to vector<3x256xf32>
    %15 = arith.addf %13, %14 : vector<3x256xf32>
    %cst_12 = arith.constant 0.000000e+00 : f32
    %16 = vector.broadcast %cst_12 : f32 to vector<3x256xf32>
    %17 = arith.maximumf %15, %16 : vector<3x256xf32>
    %c0_13 = arith.constant 0 : index
    %c0_14 = arith.constant 0 : index
    %c0_15 = arith.constant 0 : index
    %18 = vector.load %arg7[%c0_13, %c0_14, %c0_15] : memref<2x3x256xf32, #tpu.memory_space<vmem>>, vector<1x3x256xf32>
    %19 = vector.shape_cast %18 : vector<1x3x256xf32> to vector<3x256xf32>
    %20 = vector.shape_cast %17 : vector<3x256xf32> to vector<1x3x256xf32>
    tpu.vector_store %arg7[%c0_13, %c0_14, %c0_15], %20 {strides = array<i32>} : memref<2x3x256xf32, #tpu.memory_space<vmem>>, vector<1x3x256xf32>,
    %c1 = arith.constant 1 : index
    %c0_16 = arith.constant 0 : index
    %c0_17 = arith.constant 0 : index
    %21 = vector.load %arg2[%c1, %c0_16, %c0_17] : memref<2x9x256xf32, #tpu.memory_space<vmem>>, vector<1x9x256xf32>
    %22 = vector.shape_cast %21 : vector<1x9x256xf32> to vector<9x256xf32>
    %cst_18 = arith.constant dense<0.000000e+00> : vector<4x256xf32>
    %23 = tpu.matmul %0, %22, %cst_18 {dimension_numbers = #tpu.dot_dimension_numbers<[1], [0], [0], [1], [0, 0, 1, 1], [], []>} : vector<4x9xf32>, vector<9x256xf32>, vector<4x256xf32> -> vector<4x256xf32>
    %24 = vector.broadcast %3 : vector<4x1xf32> to vector<4x256xf32>
    %25 = arith.addf %23, %24 : vector<4x256xf32>
    %cst_19 = arith.constant 0.000000e+00 : f32
    %26 = vector.broadcast %cst_19 : f32 to vector<4x256xf32>
    %27 = arith.maximumf %25, %26 : vector<4x256xf32>
    %cst_20 = arith.constant dense<0.000000e+00> : vector<3x256xf32>
    %28 = tpu.matmul %1, %27, %cst_20 {dimension_numbers = #tpu.dot_dimension_numbers<[1], [0], [0], [1], [0, 0, 1, 1], [], []>} : vector<3x4xf32>, vector<4x256xf32>, vector<3x256xf32> -> vector<3x256xf32>
    %29 = vector.broadcast %5 : vector<3x1xf32> to vector<3x256xf32>
    %30 = arith.addf %28, %29 : vector<3x256xf32>
    %cst_21 = arith.constant 0.000000e+00 : f32
    %31 = vector.broadcast %cst_21 : f32 to vector<3x256xf32>
    %32 = arith.maximumf %30, %31 : vector<3x256xf32>
    %c1_22 = arith.constant 1 : index
    %c0_23 = arith.constant 0 : index
    %c0_24 = arith.constant 0 : index
    %33 = vector.load %arg7[%c1_22, %c0_23, %c0_24] : memref<2x3x256xf32, #tpu.memory_space<vmem>>, vector<1x3x256xf32>
    %34 = vector.shape_cast %33 : vector<1x3x256xf32> to vector<3x256xf32>
    %35 = vector.shape_cast %32 : vector<3x256xf32> to vector<1x3x256xf32>
    tpu.vector_store %arg7[%c1_22, %c0_23, %c0_24], %35 {strides = array<i32>} : memref<2x3x256xf32, #tpu.memory_space<vmem>>, vector<1x3x256xf32>,
    return
  }
  func.func @transform_0(%arg0: i32, %arg1: i32) -> (i32, i32, i32) {
    %c0_i32 = arith.constant 0 : i32
    %c0_i32_0 = arith.constant 0 : i32
    return %arg0, %c0_i32, %arg1 : i32, i32, i32
  }
  func.func @transform_1(%arg0: i32, %arg1: i32) -> (i32, i32) {
    %c0_i32 = arith.constant 0 : i32
    %c0_i32_0 = arith.constant 0 : i32
    %c0_i32_1 = arith.constant 0 : i32
    return %c0_i32, %c0_i32_0 : i32, i32
  }
  func.func @transform_2(%arg0: i32, %arg1: i32) -> (i32, i32) {
    %c0_i32 = arith.constant 0 : i32
    %c0_i32_0 = arith.constant 0 : i32
    %c0_i32_1 = arith.constant 0 : i32
    return %c0_i32, %c0_i32_0 : i32, i32
  }
  func.func @transform_3(%arg0: i32, %arg1: i32) -> (i32, i32) {
    %c0_i32 = arith.constant 0 : i32
    %c0_i32_0 = arith.constant 0 : i32
    %c0_i32_1 = arith.constant 0 : i32
    return %c0_i32, %c0_i32_0 : i32, i32
  }
  func.func @transform_4(%arg0: i32, %arg1: i32) -> (i32, i32) {
    %c0_i32 = arith.constant 0 : i32
    %c0_i32_0 = arith.constant 0 : i32
    %c0_i32_1 = arith.constant 0 : i32
    return %c0_i32, %c0_i32_0 : i32, i32
  }
  func.func @transform_5(%arg0: i32, %arg1: i32) -> (i32, i32, i32) {
    %c0_i32 = arith.constant 0 : i32
    %c0_i32_0 = arith.constant 0 : i32
    return %arg0, %c0_i32, %arg1 : i32, i32, i32
  }
}

</mosaic_0001>

<bundles_post_ra>
// kernel: tpu_custom_call.1
= control target key start
LH: loop header
LB: loop body
LE: loop exit
PB: predicated region body
PF: predicated region fallthrough
CT: control target
= control target key end

     0   :  { %vm37_vm0 = vcmask 1040384   ;;  %v404_v3 = vmov 0.0   ;;  %v405_v4 = vmov 0   ;;  %vm33_vm1 = vcmask 72704   ;;  %s490_s0 = inlined_call_operand.vmem [shape: f32[2,9,256], index: 0, kind: input, shape index: {}]   ;;  %s491_s1 = inlined_call_operand.vmem [shape: f32[4,9], index: 1, kind: input, shape index: {}]   ;;  %s492_s2 = inlined_call_operand.vmem [shape: f32[4,128], index: 2, kind: input, shape index: {}]   ;;  %s493_s4 = inlined_call_operand.vmem [shape: f32[3,128], index: 4, kind: input, shape index: {}]   ;;  %s494_s3 = inlined_call_operand.vmem [shape: f32[3,4], index: 3, kind: input, shape index: {}]   ;;  %s495_s5 = inlined_call_operand.vmem [shape: f32[2,3,256], index: 5, kind: output, shape index: {}]  }
   0x1   :  { %v27_v0 = vld [vmem:[%s490_s0 + $0x18] sm:$0x1]  ;;  %v26_v1 = vld [vmem:[%s490_s0 + $0x10] sm:$0x1]  ;;  %v25_v2 = vld [vmem:[%s490_s0 + $0x8] sm:$0xff]  ;;  %108 = vmatprep.mubr.f32.mxu0 %v404_v3  ;;  %403 = vset.pattern.permute.xlu0 %v405_v4  ;;  %vm126_vm2 = vcmask 1043456  }
   0x2   :  { %384 = vmatprep.subr.msk.mxu0 %vm37_vm0, %v27_v0  ;;  %v24_v5 = vld [vmem:[%s490_s0] sm:$0xff]  ;;  %197 = vmatprep.mubr.f32.mxu1 %v404_v3  ;;  %vm122_vm3 = vcmask 31744   ;;  %v393_v17 = vld [vmem:[%s490_s0 + $0x38] sm:$0x1]  ;;  %v392_v18 = vld [vmem:[%s490_s0 + $0x30] sm:$0x1] }
   0x3   :  { %v22_v6 = vld [vmem:[%s492_s2] sm:$0xf]  ;;  %385 = vmatpush1.msk.msra.mxu0 %vm37_vm0, %v26_v1  ;;  %v391_v19 = vld [vmem:[%s490_s0 + $0x28] sm:$0xff] }
   0x4   :  { %v20_v7 = vld [vmem:[%s491_s1] sm:$0xf]  ;;  %30 = vperm.xlu0 %403, %v22_v6   ;;  %74 = vmatprep.subr.mxu0 %v25_v2 }
   0x5   :  { %v23_v8 = vld [vmem:[%s493_s4] sm:$0x7]  ;;  %75 = vmatpush1.msra.mxu0 %v24_v5 }
   0x6   :  { %386 = vmatmul.mubr.msk.f32.vlgmr.msra.gmra.mxu0 %vm33_vm1, %v20_v7  ;;  %v21_v16 = vld [vmem:[%s494_s3] sm:$0x7] }
   0x7   :  { %365 = vmatprep.mubr.f32.mxu0 %v404_v3  ;;  %v390_v20 = vld [vmem:[%s490_s0 + $0x20] sm:$0xff] }
   0x8   :  { %119 = vperm.xlu0 %403, %v23_v8  }
  0x7f   :  { %v31_v10 = vpop.permute.xlu0 %30 }
  0x83   :  { %v120_v21 = vpop.permute.xlu0 %119 }
  0xc6   :  { %v110_v9 = vpop.f32.mrf.mxu0 }
  0xc7   :  { %v111_v11 = vadd.f32 %v110_v9, %v31_v10 }
  0xc8   :  { %v112_v12 = vpop.f32.mrf.mxu0 }
  0xc9   :  { %v113_v13 = vadd.f32 %v112_v12, %v31_v10  ;;  %v115_v15 = vmax.f32 %v111_v11, 0.0 }
  0xcb   :  { %v116_v14 = vmax.f32 %v113_v13, 0.0 }
  0xcd   :  { %387 = vmatprep.subr.msk.mxu1 %vm126_vm2, %v116_v14 }
  0xce   :  { %388 = vmatpush1.msk.msra.mxu1 %vm126_vm2, %v115_v15 }
  0xcf   :  { %389 = vmatmul.mubr.msk.f32.vlgmr.msra.gmra.mxu1 %vm122_vm3, %v21_v16  ;;  %394 = vmatprep.subr.msk.mxu1 %vm37_vm0, %v393_v17 }
  0xd0   :  { %395 = vmatpush1.msk.msra.mxu1 %vm37_vm0, %v392_v18  ;;  %286 = vmatprep.mubr.f32.mxu1 %v404_v3 }
  0xd1   :  { %252 = vmatprep.subr.mxu1 %v391_v19 }
  0xd2   :  { %253 = vmatpush1.msra.mxu1 %v390_v20 }
  0xd3   :  { %396 = vmatmul.mubr.msk.f32.vlgmr.msra.gmra.mxu1 %vm33_vm1, %v20_v7 }
 0x18f   :  { %v199_v22 = vpop.f32.mrf.mxu1 }
 0x190   :  { %v200_v23 = vadd.f32 %v199_v22, %v120_v21 }
 0x191   :  { %v201_v24 = vpop.f32.mrf.mxu1 }
 0x192   :  { %v202_v25 = vadd.f32 %v201_v24, %v120_v21  ;;  %v204_v27 = vmax.f32 %v200_v23, 0.0 }
 0x193   :  { %v288_v26 = vpop.f32.mrf.mxu1 }
 0x194   :  { %v205_v28 = vmax.f32 %v202_v25, 0.0  ;;  %v289_v29 = vadd.f32 %v288_v26, %v31_v10 }
 0x195   :  { %v290_v30 = vpop.f32.mrf.mxu1 }
 0x196   :  { %v208_v31 = vcombine.low %v204_v27, %v205_v28  ;;  %v291_v32 = vadd.f32 %v290_v30, %v31_v10  ;;  %v293_v34 = vmax.f32 %v289_v29, 0.0 }
 0x198   :  { %210 = vst [vmem:[%s495_s5] sm:$0x77] %v208_v31  ;;  %v294_v33 = vmax.f32 %v291_v32, 0.0 }
 0x19a   :  { %397 = vmatprep.subr.msk.mxu0 %vm126_vm2, %v294_v33 }
 0x19b   :  { %398 = vmatpush1.msk.msra.mxu0 %vm126_vm2, %v293_v34 }
 0x19c   :  { %399 = vmatmul.mubr.msk.f32.vlgmr.msra.gmra.mxu0 %vm122_vm3, %v21_v16 }
 0x25c   :  { %v367_v35 = vpop.f32.mrf.mxu0 }
 0x25d   :  { %v368_v36 = vadd.f32 %v367_v35, %v120_v21 }
 0x25e   :  { %v369_v37 = vpop.f32.mrf.mxu0 }
 0x25f   :  { %v370_v38 = vadd.f32 %v369_v37, %v120_v21  ;;  %v372_v39 = vmax.f32 %v368_v36, 0.0 }
 0x261   :  { %v373_v40 = vmax.f32 %v370_v38, 0.0 }
 0x263   :  { %v376_v41 = vcombine.low %v372_v39, %v373_v40 }
 0x265   :  { %400 = vst [vmem:[%s495_s5 + $0x8] sm:$0x77] %v376_v41 }

</bundles_post_ra>
